<compile_context>
chip_gen: v7x
topology: tpu7x:2x2x1
jax: 0.10.0
libtpu: 0.0.40
codegen_flags: <defaults>
</compile_context>

<pallas_src>
import functools

import jax
import jax.numpy as jnp
from jax.experimental import pallas as pl
from jax.experimental.pallas import tpu as pltpu
from jax.scipy.linalg import block_diag


def _round_up(x, m):
    return ((x + m - 1) // m) * m


# ---------------------------------------------------------------------------
# Kernel
# ---------------------------------------------------------------------------
def _tarnet_kernel(layer_meta, x_ref, slab_ref, out_ref):
    """Full TarNet forward for one batch tile.

    x_ref:    (tile_b, input_dim)            native batch-major layout
    slab_ref: (slab_rows, 128)               packed [W | b] rows, one chunk/layer
    out_ref:  (treatments * out_dim, tile_b) lane-dense output slab
    layer_meta: static tuple of (row_offset, dout, din) per fused layer;
                last layer uses Sigmoid, all others ReLU.
    """
    n_layers = len(layer_meta)
    h = None
    for li, (ro, dout, din) in enumerate(layer_meta):
        w = slab_ref[ro:ro + dout, :din]             # (dout, din)  static slice
        b = slab_ref[ro:ro + dout, din:din + 1]      # (dout, 1)    static slice
        if li == 0:
            # x block is (tile_b, din): contract over features with the
            # operand-transpose done on-chip -> (dout, tile_b), batch on lanes.
            z = jax.lax.dot_general(
                w, x_ref[...],
                dimension_numbers=(((1,), (1,)), ((), ())),
                preferred_element_type=jnp.float32) + b
        else:
            z = jnp.dot(w, h, preferred_element_type=jnp.float32) + b
        if li == n_layers - 1:
            h = jax.nn.sigmoid(z)                    # last_activation = Sigmoid
        else:
            h = jnp.maximum(z, 0.0)                  # activation = ReLU
    out_ref[...] = h.astype(out_ref.dtype)


# ---------------------------------------------------------------------------
# Weight fusion + slab packing (host side, runs once)
# ---------------------------------------------------------------------------
def _fuse_and_pack(share_params, tower_params, dtype):
    """Fuse the towers into wide layers and pack all (W, b) into one slab.

    Weights are in PyTorch layout: W (out, in), b (out,).
    Returns (slab (R, C) in `dtype`, layer_meta tuple of (row_offset, dout, din)).
    """
    layers = list(share_params)

    n_tower_layers = len(tower_params[0])
    for li in range(n_tower_layers):
        ws = [tw[li][0] for tw in tower_params]
        bs = [tw[li][1] for tw in tower_params]
        if li == 0:
            wf = jnp.concatenate(ws, axis=0)         # all towers read shared h
        else:
            wf = block_diag(*ws)                     # towers stay independent
        bf = jnp.concatenate(bs, axis=0)
        layers.append((wf, bf))

    itemsize = jnp.dtype(dtype).itemsize
    sublane = 8 * (4 // itemsize)                    # 8 for f32, 16 for bf16
    max_in = max(int(w.shape[1]) for w, _ in layers)
    cols = _round_up(max_in + 1, 128)                # +1 column holds the bias
    chunks, meta, row = [], [], 0
    for w, b in layers:
        dout, din = int(w.shape[0]), int(w.shape[1])
        rows_p = _round_up(dout, sublane)            # sublane-tile-aligned chunks
        chunk = jnp.zeros((rows_p, cols), dtype)
        chunk = chunk.at[:dout, :din].set(w.astype(dtype))
        chunk = chunk.at[:dout, din].set(b.astype(dtype))
        chunks.append(chunk)
        meta.append((row, dout, din))
        row += rows_p
    slab = jnp.concatenate(chunks, axis=0)
    return slab, tuple(meta)


# ---------------------------------------------------------------------------
# Tile selection
# ---------------------------------------------------------------------------
def _select_tile_b(B, requested):
    """Largest lane-dense (multiple-of-128) divisor of B that is <= requested,
    preferring one that keeps grid length >= 2 (v7x has 2 TensorCores).
    Falls back to a single full-batch tile, which is always a legal block."""
    requested = max(1, min(requested, B))
    cands = [t for t in range(128, requested + 1, 128) if B % t == 0]
    if cands:
        multi = [t for t in cands if B // t >= 2]
        return max(multi) if multi else max(cands)
    return B


# ---------------------------------------------------------------------------
# Wrapper
# ---------------------------------------------------------------------------
def tarnet_forward(x, share_params, tower_params, *, tile_b=2048):
    """x: (B, input_dim), f32 or bf16 (bf16 halves the dominant HBM traffic;
    accumulation is always f32).  Returns a list of (B, out_dim) arrays, one
    per treatment tower, matching the PyTorch module."""
    B, input_dim = x.shape
    treatments = len(tower_params)
    out_dim = int(tower_params[0][-1][0].shape[0])
    out_rows = treatments * out_dim
    dtype = x.dtype
    itemsize = jnp.dtype(dtype).itemsize

    tb = _select_tile_b(B, tile_b)
    grid = (B // tb,)

    slab, layer_meta = _fuse_and_pack(share_params, tower_params, dtype)

    kernel = functools.partial(_tarnet_kernel, layer_meta)

    flops = 2 * sum(dout * din for _, dout, din in layer_meta) * B
    bytes_accessed = (B * input_dim * itemsize
                      + out_rows * B * itemsize
                      + int(slab.size) * jnp.dtype(slab.dtype).itemsize)
    cost = pl.CostEstimate(flops=flops,
                           transcendentals=out_rows * B,
                           bytes_accessed=bytes_accessed)

    out_t = pl.pallas_call(
        kernel,
        grid=grid,
        in_specs=[
            pl.BlockSpec((tb, input_dim), lambda i: (i, 0)),      # x, streamed
            pl.BlockSpec(slab.shape, lambda i: (0, 0)),           # resident slab
        ],
        out_specs=pl.BlockSpec((out_rows, tb), lambda i: (0, i)),  # lane-dense
        out_shape=jax.ShapeDtypeStruct((out_rows, B), dtype),
        compiler_params=pltpu.CompilerParams(
            dimension_semantics=("parallel",),
        ),
        cost_estimate=cost,
    )(x, slab)

    # Single tiny (T*out_dim, B) transpose instead of T slice+transpose copies.
    out = out_t.T                                    # (B, T*out_dim)
    return [out[:, t * out_dim:(t + 1) * out_dim] for t in range(treatments)]


# ---------------------------------------------------------------------------
# Deterministic parameter init (PyTorch nn.Linear layout) + pure-JAX reference
# ---------------------------------------------------------------------------
def init_params(key, input_dim, share_layers, treatment_layers, treatments):
    def linear(key, din, dout):
        kw, kb = jax.random.split(key)
        bound = 1.0 / jnp.sqrt(din)
        w = jax.random.uniform(kw, (dout, din), jnp.float32, -bound, bound)
        b = jax.random.uniform(kb, (dout,), jnp.float32, -bound, bound)
        return w, b

    keys = jax.random.split(key, 1 + treatments)

    share_params = []
    d = input_dim
    sk = jax.random.split(keys[0], len(share_layers))
    for i, h in enumerate(share_layers):
        share_params.append(linear(sk[i], d, h))
        d = h

    tower_params = []
    for t in range(treatments):
        tk = jax.random.split(keys[1 + t], len(treatment_layers))
        d = share_layers[-1]
        tower = []
        for i, h in enumerate(treatment_layers):
            tower.append(linear(tk[i], d, h))
            d = h
        tower_params.append(tower)
    return share_params, tower_params


def tarnet_reference(x, share_params, tower_params):
    h = x
    for w, b in share_params:
        h = jnp.maximum(h @ w.T + b, 0.0)
    outs = []
    for tower in tower_params:
        t = h
        for li, (w, b) in enumerate(tower):
            z = t @ w.T + b
            t = jax.nn.sigmoid(z) if li == len(tower) - 1 else jnp.maximum(z, 0.0)
        outs.append(t)
    return outs


# ---------------------------------------------------------------------------
if __name__ == "__main__":
    INPUT_DIM = 16
    SHARE_LAYERS = [32, 32]
    TREATMENT_LAYERS = [32, 1]
    TREATMENTS = 2
    B = 512   # tile selector picks tile_b=256 -> grid of 2 (both v7x TCs busy)

    key = jax.random.PRNGKey(0)
    kx, kp = jax.random.split(key)
    x = jax.random.normal(kx, (B, INPUT_DIM), jnp.float32)

    share_params, tower_params = init_params(
        kp, INPUT_DIM, SHARE_LAYERS, TREATMENT_LAYERS, TREATMENTS
    )

    refs = tarnet_reference(x, share_params, tower_params)

    # --- f32 path (tight tolerance) ---
    outs = tarnet_forward(x, share_params, tower_params)
    outs = [jax.block_until_ready(o) for o in outs]
    for o, r in zip(outs, refs):
        assert o.shape == r.shape, (o.shape, r.shape)
        err = float(jnp.abs(o - r).max())
        assert err < 3e-5, err

    # --- bf16 storage / f32 accumulation path (halves x + slab HBM traffic) ---
    x_bf16 = x.astype(jnp.bfloat16)
    outs_bf = tarnet_forward(x_bf16, share_params, tower_params)
    outs_bf = [jax.block_until_ready(o) for o in outs_bf]
    for o, r in zip(outs_bf, refs):
        assert o.shape == r.shape, (o.shape, r.shape)
        err = float(jnp.abs(o.astype(jnp.float32) - r).max())
        assert err < 5e-2, err   # bf16-rounded inputs/weights, f32 accumulation

    print("KERNEL_OK")
</pallas_src>

<mosaic_0001>
module attributes {stable_mosaic.version = 11 : i64} {
  func.func @_tarnet_kernel(%arg0: i32, %arg1: memref<256x16xf32, #tpu.memory_space<vmem>>, %arg2: memref<136x128xf32, #tpu.memory_space<vmem>>, %arg3: memref<2x256xf32, #tpu.memory_space<vmem>>) attributes {dimension_semantics = [#tpu.dimension_semantics<parallel>], iteration_bounds = array<i64: 2>, scalar_prefetch = 0 : i64, scratch_operands = 0 : i64, tpu.core_type = #tpu.core_type<tc>, window_params = [{transform_indices = @transform_0, window_bounds = array<i64: 256, 16>}, {pipeline_mode = #tpu.pipeline_mode<synchronous>, transform_indices = @transform_1, window_bounds = array<i64: 136, 128>}, {transform_indices = @transform_2, window_bounds = array<i64: 2, 256>}]} {
    %c0 = arith.constant 0 : index
    %c0_0 = arith.constant 0 : index
    %0 = vector.load %arg2[%c0, %c0_0] : memref<136x128xf32, #tpu.memory_space<vmem>>, vector<32x16xf32>
    %c0_1 = arith.constant 0 : index
    %c16 = arith.constant 16 : index
    %1 = vector.load %arg2[%c0_1, %c16] : memref<136x128xf32, #tpu.memory_space<vmem>>, vector<32x1xf32>
    %c0_2 = arith.constant 0 : index
    %c0_3 = arith.constant 0 : index
    %2 = vector.load %arg1[%c0_2, %c0_3] : memref<256x16xf32, #tpu.memory_space<vmem>>, vector<256x16xf32>
    %cst = arith.constant dense<0.000000e+00> : vector<32x256xf32>
    %3 = tpu.matmul %0, %2, %cst {dimension_numbers = #tpu.dot_dimension_numbers<[1], [1], [0], [0], [0, 0, 1, 0], [], []>} : vector<32x16xf32>, vector<256x16xf32>, vector<32x256xf32> -> vector<32x256xf32>
    %4 = vector.broadcast %1 : vector<32x1xf32> to vector<32x256xf32>
    %5 = arith.addf %3, %4 : vector<32x256xf32>
    %cst_4 = arith.constant 0.000000e+00 : f32
    %6 = vector.broadcast %cst_4 : f32 to vector<32x256xf32>
    %7 = arith.maximumf %5, %6 : vector<32x256xf32>
    %c32 = arith.constant 32 : index
    %c0_5 = arith.constant 0 : index
    %8 = vector.load %arg2[%c32, %c0_5] : memref<136x128xf32, #tpu.memory_space<vmem>>, vector<32x32xf32>
    %c32_6 = arith.constant 32 : index
    %c32_7 = arith.constant 32 : index
    %9 = vector.load %arg2[%c32_6, %c32_7] : memref<136x128xf32, #tpu.memory_space<vmem>>, vector<32x1xf32>
    %cst_8 = arith.constant dense<0.000000e+00> : vector<32x256xf32>
    %10 = tpu.matmul %8, %7, %cst_8 {dimension_numbers = #tpu.dot_dimension_numbers<[1], [0], [0], [1], [0, 0, 1, 1], [], []>} : vector<32x32xf32>, vector<32x256xf32>, vector<32x256xf32> -> vector<32x256xf32>
    %11 = vector.broadcast %9 : vector<32x1xf32> to vector<32x256xf32>
    %12 = arith.addf %10, %11 : vector<32x256xf32>
    %cst_9 = arith.constant 0.000000e+00 : f32
    %13 = vector.broadcast %cst_9 : f32 to vector<32x256xf32>
    %14 = arith.maximumf %12, %13 : vector<32x256xf32>
    %c64 = arith.constant 64 : index
    %c0_10 = arith.constant 0 : index
    %15 = vector.load %arg2[%c64, %c0_10] : memref<136x128xf32, #tpu.memory_space<vmem>>, vector<64x32xf32>
    %c64_11 = arith.constant 64 : index
    %c32_12 = arith.constant 32 : index
    %16 = vector.load %arg2[%c64_11, %c32_12] : memref<136x128xf32, #tpu.memory_space<vmem>>, vector<64x1xf32>
    %cst_13 = arith.constant dense<0.000000e+00> : vector<64x256xf32>
    %17 = tpu.matmul %15, %14, %cst_13 {dimension_numbers = #tpu.dot_dimension_numbers<[1], [0], [0], [1], [0, 0, 1, 1], [], []>} : vector<64x32xf32>, vector<32x256xf32>, vector<64x256xf32> -> vector<64x256xf32>
    %18 = vector.broadcast %16 : vector<64x1xf32> to vector<64x256xf32>
    %19 = arith.addf %17, %18 : vector<64x256xf32>
    %cst_14 = arith.constant 0.000000e+00 : f32
    %20 = vector.broadcast %cst_14 : f32 to vector<64x256xf32>
    %21 = arith.maximumf %19, %20 : vector<64x256xf32>
    %c128 = arith.constant 128 : index
    %c0_15 = arith.constant 0 : index
    %22 = vector.load %arg2[%c128, %c0_15] : memref<136x128xf32, #tpu.memory_space<vmem>>, vector<2x64xf32>
    %c128_16 = arith.constant 128 : index
    %c64_17 = arith.constant 64 : index
    %23 = vector.load %arg2[%c128_16, %c64_17] : memref<136x128xf32, #tpu.memory_space<vmem>>, vector<2x1xf32>
    %cst_18 = arith.constant dense<0.000000e+00> : vector<2x256xf32>
    %24 = tpu.matmul %22, %21, %cst_18 {dimension_numbers = #tpu.dot_dimension_numbers<[1], [0], [0], [1], [0, 0, 1, 1], [], []>} : vector<2x64xf32>, vector<64x256xf32>, vector<2x256xf32> -> vector<2x256xf32>
    %25 = vector.broadcast %23 : vector<2x1xf32> to vector<2x256xf32>
    %26 = arith.addf %24, %25 : vector<2x256xf32>
    %27 = arith.negf %26 : vector<2x256xf32>
    %28 = math.exp %27 : vector<2x256xf32>
    %cst_19 = arith.constant 1.000000e+00 : f32
    %29 = vector.broadcast %cst_19 : f32 to vector<2x256xf32>
    %30 = arith.addf %29, %28 : vector<2x256xf32>
    %31 = arith.divf %29, %30 : vector<2x256xf32>
    %c0_20 = arith.constant 0 : index
    %c0_21 = arith.constant 0 : index
    %32 = vector.load %arg3[%c0_20, %c0_21] : memref<2x256xf32, #tpu.memory_space<vmem>>, vector<2x256xf32>
    tpu.vector_store %arg3[%c0_20, %c0_21], %31 {strides = array<i32>} : memref<2x256xf32, #tpu.memory_space<vmem>>, vector<2x256xf32>,
    return
  }
  func.func @transform_0(%arg0: i32) -> (i32, i32) {
    %c0_i32 = arith.constant 0 : i32
    %c0_i32_0 = arith.constant 0 : i32
    return %arg0, %c0_i32 : i32, i32
  }
  func.func @transform_1(%arg0: i32) -> (i32, i32) {
    %c0_i32 = arith.constant 0 : i32
    %c0_i32_0 = arith.constant 0 : i32
    %c0_i32_1 = arith.constant 0 : i32
    return %c0_i32, %c0_i32_0 : i32, i32
  }
  func.func @transform_2(%arg0: i32) -> (i32, i32) {
    %c0_i32 = arith.constant 0 : i32
    %c0_i32_0 = arith.constant 0 : i32
    return %c0_i32, %arg0 : i32, i32
  }
}

</mosaic_0001>

<bundles_post_ra>
// kernel: tpu_custom_call.1
= control target key start
LH: loop header
LB: loop body
LE: loop exit
PB: predicated region body
PF: predicated region fallthrough
CT: control target
= control target key end

     0   :  { %7 = vsyncpa [#allocation3], 0  ;;  %s1549_s0 = inlined_call_operand.vmem [shape: f32[512,16], index: 0, kind: input, shape index: {}]   ;;  %s1550_s1 = inlined_call_operand.vmem [shape: f32[136,128], index: 1, kind: input, shape index: {}]   ;;  %s1551_s2 = inlined_call_operand.hbm [shape: f32[2,512], index: 2, kind: output, shape index: {}]  }
   0x1   :  { %9 = vsyncpa [#allocation3 + $0x1], 0  ;;  %s1230_s9 = smov 0   ;;  %s1232_s10 = smov 0  }
   0x2   :  { %s1234_s11 = smov 0   ;;  %s1236_s12 = smov 0  }
   0x3 LB: > { %s1251_s13 = sadd.s32 4294967295, %s1208_s12   ;;  %s904_s14 = sadd.s32 4294967294, %s1208_s12   ;;  %s1208_s12 = sphi %s1236_s12, %s1559_s12   ;;  %s1204_s11 = sphi %s1234_s11, %s1558_s11   ;;  %s1200_s10 = sphi %s1232_s10, %s1557_s10   ;;  %s1196_s9 = sphi %s1230_s9, %s1556_s9  }
   0x4   : > { %s1255_s15 = sadd.s32 1, %s1208_s12   ;;  %s69_s16 = sadd.s32 1, %s1204_s11 }
   0x5   : > { %s66_s17 = ssub.s32 %s1208_s12, %s1255_s15  ;;  %p79_p0 = scmp.ne.s32.totalorder %s1204_s11, %s1200_s10 }
   0x6   : > { %p67_p1 = scmp.eq.s32.totalorder %s66_s17, 0  ;;  %p80_p2 = scmp.eq.s32.totalorder %s1251_s13, 1 }
   0x7   : > { %p85_p3 = scmp.ne.s32.totalorder %s1200_s10, %s1196_s9  ;;  %p86_p4 = scmp.eq.s32.totalorder %s904_s14, 1 }
   0x8   : > { %s1266_s18 = scalar_select %p67_p1, %s1204_s11, %s69_s16  }
   0x9   : > { %p1268_p5 = por %p80_p2, %p79_p0  ;;  %p1272_p6 = por %p86_p4, %p85_p3 }
   0xa   : > { %p907_p7 = scmp.ge.s32.totalorder %s1208_s12, 1  ;;  %p116_p8 = scmp.lt.s32.totalorder %s1208_s12, 3 }
   0xc   : > { %p117_p9 = pnand %p907_p7, %p116_p8 }
   0xd   : > { %s909_s21 = sshll.u32 (!%p117_p9), %s1251_s13, 5  ;;  %vm201_vm0 = vcmask (!%p117_p9), 130048   ;;  %v1282_v0 = vld [vmem:[%s1550_s1] sm:$0xff] (!%p117_p9)  ;;  %v1210_v1 = vmov (!%p117_p9), 16   ;;  %v1289_v2 = vld [vmem:[%s1550_s1 + $0x10] sm:$0xff] (!%p117_p9)  ;;  %v1296_v3 = vld [vmem:[%s1550_s1 + $0x8] sm:$0xff] (!%p117_p9) }
   0xe   : > { %120 = sbr.rel (%p117_p9) target bundleno = 1069 (0x42d), region = 28  ;;  %p139_p10 = scmp.lt.s32.totalorder (!%p117_p9), %s909_s21, 63  ;;  %1001 = vmatprep.mubr.msk.f32.mxu0 (!%p117_p9), %vm201_vm0, %v1282_v0  ;;  %1132 = vset.pattern.permute.xlu0 (!%p117_p9), %v1210_v1  ;;  %vm1305_vm1 = vmpackc.low (!%p117_p9), %vm201_vm0, %vm201_vm0  ;;  %v1312_v5 = vld [vmem:[%s1550_s1 + $0x18] sm:$0xff] (!%p117_p9)  ;;  %v1211_v54 = vmov (!%p117_p9), 0.0   ;;  %v1398_v55 = vld [vmem:[%s1550_s1 + $0x20] sm:$0xff] (!%p117_p9)  ;;  %v1212_v57 = vmov (!%p117_p9), 32  }
   0xf   : > { %183 = vperm.xlu0 (!%p117_p9), %1132, %v1282_v0   ;;  %1133 = vset.pattern.permute.xlu1 (!%p117_p9), %v1210_v1  ;;  %v1403_v56 = vld [vmem:[%s1550_s1 + $0x28] sm:$0xff] (!%p117_p9)  ;;  %v405_v58 = vld [vmem:[%s1550_s1 + $0x30] sm:$0xff] (!%p117_p9)  ;;  %v406_v59 = vld [vmem:[%s1550_s1 + $0x38] sm:$0xff] (!%p117_p9)  ;;  %vm427_vm2 = vcmask (!%p117_p9), 261120   ;;  %vm732_vm3 = vcmask (!%p117_p9), 523264   ;;  %s135_s22 = sand.u32 (!%p117_p9), 1, %s1200_s10  }
  0x10   : > { %193 = vperm.xlu1 (!%p117_p9), %1133, %v1289_v2   ;;  %500 = vmatprep.mubr.f32.mxu1 (!%p117_p9), %v1211_v54  ;;  %v1416_v60 = vld [vmem:[%s1550_s1 + $0x40] sm:$0xff] (!%p117_p9)  ;;  %v1421_v61 = vld [vmem:[%s1550_s1 + $0x48] sm:$0xff] (!%p117_p9)  ;;  %v1428_v62 = vld [vmem:[%s1550_s1 + $0x50] sm:$0xff] (!%p117_p9)  ;;  %s908_s23 = sshll.u32 (!%p117_p9), %s135_s22, 2  ;;  %s968_s24 = sshll.u32 (!%p117_p9), %s1251_s13, 6 }
  0x11   : > { %v1433_v63 = vld [vmem:[%s1550_s1 + $0x58] sm:$0xff] (!%p117_p9)  ;;  %v1445_v1 = vld [vmem:[%s1550_s1 + $0x68] sm:$0xff] (!%p117_p9)  ;;  %s137_s25 = scalar_lea.vmem (!%p117_p9), [#allocation2], %s908_s23  ;;  %s1507_s29 = scalar_lea.hbm (!%p117_p9), %s1551_s2, %s968_s24 }
  0x12   : > { %s831_s30 = scalar_lea.sflag (!%p117_p9), [#allocation3], %s135_s22  ;;  %s1214_s13 = smov (!%p117_p9), [#allocation2]  }
  0x13   : > { %188 = vperm.xlu0 (!%p117_p9), %1132, %v1296_v3   ;;  %s1150_s4 = sshll.u32 (!%p117_p9), %s1214_s13, 4  ;;  %s1151_s4 = int_to_ptr.vmem [resolvable:$false] %s1150_s4 }
  0x14   : > { %198 = vperm.xlu1 (!%p117_p9), %1133, %v1312_v5   ;;  %s1152_s5 = scalar_lea.vmem (!%p117_p9), %s1151_s4, 128 }
  0x15   : > { %s1561_s21 = smov (!%p139_p10, %s909_s21), 63 }
  0x16   : > { %s910_s26 = sshll.u32 %s1561_s21, 3 }
  0x17   : > { %s1301_s3 = scalar_lea.vmem %s1549_s0, %s910_s26  ;;  %1134 = vset.pattern.permute.xlu0 %v1212_v57  ;;  %s845_s26 = sshll.u32 %s137_s25, 4  ;;  %s1509_s26 = int_to_ptr.vmem [resolvable:$true] %s845_s26 }
  0x18   : > { %v165_v6 = vld [vmem:[%s1301_s3 + $0x80] sm:$0xff]  ;;  %v166_v7 = vld [vmem:[%s1301_s3 + $0x88] sm:$0xff]  ;;  %v167_v11 = vld [vmem:[%s1301_s3 + $0x90] sm:$0xff]  ;;  %1135 = vset.pattern.permute.xlu1 %v1212_v57  ;;  %409 = vperm.xlu0 %1134, %v1398_v55   ;;  %p1153_p0 = scmp.lt.s32.totalorder %s1509_s26, %s1151_s4 }
  0x19   : > { %v149_v8 = vld [vmem:[%s1301_s3] sm:$0xff]  ;;  %v1009_v9 = vpack.c.bf16 %v166_v7, %v165_v6  ;;  %v150_v10 = vld [vmem:[%s1301_s3 + $0x8] sm:$0xff]  ;;  %v168_v12 = vld [vmem:[%s1301_s3 + $0x98] sm:$0xff]  ;;  %414 = vperm.xlu1 %1135, %v1403_v56  }
  0x1a   : > { %v1012_v13 = vpack.c.bf16 %v150_v10, %v149_v8  ;;  %v1015_v14 = vpack.c.bf16 %v168_v12, %v167_v11  ;;  %v151_v15 = vld [vmem:[%s1301_s3 + $0x10] sm:$0xff]  ;;  %v152_v16 = vld [vmem:[%s1301_s3 + $0x18] sm:$0xff]  ;;  %v169_v17 = vld [vmem:[%s1301_s3 + $0xa0] sm:$0xff] }
  0x1b   : > { %1011 = vmatprep.subr.msk.bf16.mxu0 %vm1305_vm1, %v1009_v9  ;;  %v170_v18 = vld [vmem:[%s1301_s3 + $0xa8] sm:$0xff]  ;;  %v1018_v19 = vpack.c.bf16 %v152_v16, %v151_v15  ;;  %v153_v21 = vld [vmem:[%s1301_s3 + $0x20] sm:$0xff]  ;;  %v171_v23 = vld [vmem:[%s1301_s3 + $0xb0] sm:$0xff] }
  0x1c   : > { %1014 = vmatpush3.bf16.xpose.msk.msra.mxu0 %vm1305_vm1, %v1012_v13  ;;  %v1021_v20 = vpack.c.bf16 %v170_v18, %v169_v17  ;;  %v154_v22 = vld [vmem:[%s1301_s3 + $0x28] sm:$0xff]  ;;  %v172_v24 = vld [vmem:[%s1301_s3 + $0xb8] sm:$0xff]  ;;  %v155_v27 = vld [vmem:[%s1301_s3 + $0x30] sm:$0xff]  ;;  %424 = vperm.xlu0 %1134, %v406_v59  }
  0x1d   : > { %1017 = vmatprep.subr.msk.bf16.mxu0 %vm1305_vm1, %v1015_v14  ;;  %v1024_v25 = vpack.c.bf16 %v154_v22, %v153_v21  ;;  %v1027_v26 = vpack.c.bf16 %v172_v24, %v171_v23  ;;  %v156_v28 = vld [vmem:[%s1301_s3 + $0x38] sm:$0xff]  ;;  %v173_v29 = vld [vmem:[%s1301_s3 + $0xc0] sm:$0xff]  ;;  %v174_v30 = vld [vmem:[%s1301_s3 + $0xc8] sm:$0xff]  ;;  %419 = vperm.xlu1 %1135, %v405_v58  }
  0x1e   : > { %v1030_v31 = vpack.c.bf16 %v156_v28, %v155_v27  ;;  %v1033_v32 = vpack.c.bf16 %v174_v30, %v173_v29  ;;  %v157_v33 = vld [vmem:[%s1301_s3 + $0x40] sm:$0xff]  ;;  %v158_v34 = vld [vmem:[%s1301_s3 + $0x48] sm:$0xff]  ;;  %v175_v35 = vld [vmem:[%s1301_s3 + $0xd0] sm:$0xff] }
  0x1f   : > { %v176_v36 = vld [vmem:[%s1301_s3 + $0xd8] sm:$0xff]  ;;  %v1036_v37 = vpack.c.bf16 %v158_v34, %v157_v33  ;;  %v159_v39 = vld [vmem:[%s1301_s3 + $0x50] sm:$0xff]  ;;  %v177_v41 = vld [vmem:[%s1301_s3 + $0xe0] sm:$0xff] }
  0x20   : > { %v1039_v38 = vpack.c.bf16 %v176_v36, %v175_v35  ;;  %v160_v40 = vld [vmem:[%s1301_s3 + $0x58] sm:$0xff]  ;;  %v178_v42 = vld [vmem:[%s1301_s3 + $0xe8] sm:$0xff]  ;;  %v161_v45 = vld [vmem:[%s1301_s3 + $0x60] sm:$0xff]  ;;  %548 = vperm.xlu0 %1134, %v1421_v61  }
  0x21   : > { %v1042_v43 = vpack.c.bf16 %v160_v40, %v159_v39  ;;  %v1045_v44 = vpack.c.bf16 %v178_v42, %v177_v41  ;;  %v162_v46 = vld [vmem:[%s1301_s3 + $0x68] sm:$0xff]  ;;  %v179_v47 = vld [vmem:[%s1301_s3 + $0xf0] sm:$0xff]  ;;  %v180_v48 = vld [vmem:[%s1301_s3 + $0xf8] sm:$0xff]  ;;  %543 = vperm.xlu1 %1135, %v1416_v60  }
  0x22   : > { %v1048_v49 = vpack.c.bf16 %v162_v46, %v161_v45  ;;  %v1051_v50 = vpack.c.bf16 %v180_v48, %v179_v47  ;;  %v163_v51 = vld [vmem:[%s1301_s3 + $0x70] sm:$0xff]  ;;  %v164_v52 = vld [vmem:[%s1301_s3 + $0x78] sm:$0xff]  ;;  %s1146_s3 = scalar_lea.vmem %s1509_s26, 64 }
  0x23   : > { %v1054_v53 = vpack.c.bf16 %v164_v52, %v163_v51  ;;  %p1147_p11 = scmp.ne.s32.totalorder %s1509_s26, %s1146_s3  ;;  %p1154_p1 = scmp.lt.s32.totalorder %s1152_s5, %s1146_s3 }
  0x24   : > { %1020 = vmatpush3.bf16.xpose.msk.msra.mxu0 %vm1305_vm1, %v1018_v19  ;;  %558 = vperm.xlu0 %1134, %v1433_v63  }
  0x25   : > { %1023 = vmatprep.subr.msk.bf16.mxu0 %vm1305_vm1, %v1021_v20  ;;  %553 = vperm.xlu1 %1135, %v1428_v62   ;;  %p1148_p12 = pnand %p1147_p11, %p1268_p5  ;;  %p1155_p2 = por %p1154_p1, %p1153_p0 }
  0x27   : > { %p1149_p13 = pneg %p1148_p12 }
  0x28   : > { %568 = vperm.xlu0 %1134, %v1445_v1  }
  0x29   : > { %p1156_p3 = pnand %p1155_p2, %p1149_p13 }
  0x2c   : > { %1026 = vmatpush3.bf16.xpose.msk.msra.mxu0 %vm1305_vm1, %v1024_v25 }
  0x2d   : > { %1029 = vmatprep.subr.msk.bf16.mxu0 %vm1305_vm1, %v1027_v26 }
  0x34   : > { %1032 = vmatpush3.bf16.xpose.msk.msra.mxu0 %vm1305_vm1, %v1030_v31 }
  0x35   : > { %1035 = vmatprep.subr.msk.bf16.mxu0 %vm1305_vm1, %v1033_v32 }
  0x3c   : > { %1038 = vmatpush3.bf16.xpose.msk.msra.mxu0 %vm1305_vm1, %v1036_v37 }
  0x3d   : > { %1041 = vmatprep.subr.msk.bf16.mxu0 %vm1305_vm1, %v1039_v38 }
  0x44   : > { %1044 = vmatpush3.bf16.xpose.msk.msra.mxu0 %vm1305_vm1, %v1042_v43 }
  0x45   : > { %1047 = vmatprep.subr.msk.bf16.mxu0 %vm1305_vm1, %v1045_v44 }
  0x4c   : > { %1050 = vmatpush3.bf16.xpose.msk.msra.mxu0 %vm1305_vm1, %v1048_v49 }
  0x4d   : > { %1053 = vmatprep.subr.msk.bf16.mxu0 %vm1305_vm1, %v1051_v50 }
  0x54   : > { %1056 = vmatpush3.bf16.xpose.msk.msra.mxu0 %vm1305_vm1, %v1054_v53 }
  0x5b   : > { %1002 = vmatmul.mubr.msk.f32.vlgmr.msra.gmra.mrb[0].mxu0 %vm201_vm0, %v1282_v0  ;;  %v1440_v0 = vld [vmem:[%s1550_s1 + $0x60] sm:$0xff] }
  0x5c   : > { %1003 = vmatprep.mubr.msk.f32.mxu0 %vm201_vm0, %v1296_v3  ;;  %563 = vperm.xlu1 %1135, %v1440_v0  }
  0x5f   : > { %1004 = vmatmul.mubr.msk.f32.gmra.mrb[2].mxu0 %vm201_vm0, %v1296_v3  ;;  %v1457_v3 = vld [vmem:[%s1550_s1 + $0x78] sm:$0xff] }
  0x60   : > { %1005 = vmatprep.mubr.msk.f32.mxu0 %vm201_vm0, %v1289_v2  ;;  %578 = vperm.xlu0 %1134, %v1457_v3  }
  0x63   : > { %1006 = vmatmul.mubr.msk.f32.gmra.mrb[4].mxu0 %vm201_vm0, %v1289_v2  ;;  %v1452_v2 = vld [vmem:[%s1550_s1 + $0x70] sm:$0xff] }
  0x64   : > { %1007 = vmatprep.mubr.msk.f32.mxu0 %vm201_vm0, %v1312_v5  ;;  %573 = vperm.xlu1 %1135, %v1452_v2  }
  0x67   : > { %1008 = vmatmul.mubr.msk.f32.gmra.mrb[6].mxu0 %vm201_vm0, %v1312_v5 }
  0x8e   : > { %v184_v4 = vpop.permute.xlu0 %183 }
  0x8f   : > { %v194_v13 = vpop.permute.xlu1 %193 }
  0x92   : > { %v189_v7 = vpop.permute.xlu0 %188 }
  0x93   : > { %v199_v24 = vpop.permute.xlu1 %198 }
  0x97   : > { %v410_v38 = vpop.permute.xlu0 %409 }
  0x98   : > { %v415_v40 = vpop.permute.xlu1 %414 }
  0x9b   : > { %v425_v57 = vpop.permute.xlu0 %424 }
  0x9c   : > { %v420_v53 = vpop.permute.xlu1 %419 }
 0x12e   : > { %v372_v5 = vpop.f32.mrb[0].mxu0 }
 0x12f   : > { %v374_v6 = vpop.f32.mrb[1].mxu0  ;;  %v373_v8 = vadd.f32 %v372_v5, %v184_v4 }
 0x130   : > { %v375_v9 = vadd.f32 %v374_v6, %v184_v4 }
 0x131   : > { %v395_v15 = vmax.f32 %v373_v8, 0.0 }
 0x132   : > { %v378_v10 = vpop.f32.mrb[2].mxu0  ;;  %v396_v17 = vmax.f32 %v375_v9, 0.0 }
 0x133   : > { %v379_v11 = vadd.f32 %v378_v10, %v189_v7  ;;  %v380_v12 = vpop.f32.mrb[3].mxu0 }
 0x134   : > { %v381_v14 = vadd.f32 %v380_v12, %v189_v7 }
 0x135   : > { %v397_v16 = vmax.f32 %v379_v11, 0.0 }
 0x136   : > { %v398_v18 = vmax.f32 %v381_v14, 0.0  ;;  %v384_v19 = vpop.f32.mrb[4].mxu0 }
 0x137   : > { %v386_v20 = vpop.f32.mrb[5].mxu0  ;;  %v1059_v21 = vpack.c.bf16 %v397_v16, %v395_v15  ;;  %v385_v23 = vadd.f32 %v384_v19, %v194_v13 }
 0x138   : > { %v1057_v22 = vpack.c.bf16 %v398_v18, %v396_v17  ;;  %v387_v25 = vadd.f32 %v386_v20, %v194_v13 }
 0x139   : > { %v399_v30 = vmax.f32 %v385_v23, 0.0 }
 0x13a   : > { %v390_v26 = vpop.f32.mrb[6].mxu0  ;;  %1058 = vmatprep.subr.bf16.mxu1 %v1057_v22  ;;  %v400_v32 = vmax.f32 %v387_v25, 0.0 }
 0x13b   : > { %v391_v27 = vadd.f32 %v390_v26, %v199_v24  ;;  %v392_v28 = vpop.f32.mrb[7].mxu0  ;;  %1060 = vmatpush1.bf16.msra.mxu1 %v1059_v21 }
 0x13c   : > { %v393_v29 = vadd.f32 %v392_v28, %v199_v24 }
 0x13d   : > { %v401_v31 = vmax.f32 %v391_v27, 0.0 }
 0x13e   : > { %v402_v33 = vmax.f32 %v393_v29, 0.0 }
 0x13f   : > { %v1063_v34 = vpack.c.bf16 %v401_v31, %v399_v30 }
 0x140   : > { %v1061_v35 = vpack.c.bf16 %v402_v33, %v400_v32 }
 0x142   : > { %1062 = vmatprep.subr.bf16.mxu1 %v1061_v35 }
 0x143   : > { %1064 = vmatpush1.bf16.msra.mxu1 %v1063_v34 }
 0x146   : > { %947 = vmatmul.mubr.msk.f32.vlgmr.msra.gmra.mrb[0].mxu1 %vm427_vm2, %v1398_v55 }
 0x147   : > { %506 = vmatprep.mubr.f32.mxu1 %v1211_v54 }
 0x14a   : > { %948 = vmatmul.mubr.msk.f32.gmra.mrb[2].mxu1 %vm427_vm2, %v1403_v56 }
 0x14b   : > { %512 = vmatprep.mubr.f32.mxu1 %v1211_v54 }
 0x14e   : > { %949 = vmatmul.mubr.msk.f32.gmra.mrb[4].mxu1 %vm427_vm2, %v405_v58 }
 0x14f   : > { %518 = vmatprep.mubr.f32.mxu1 %v1211_v54 }
 0x152   : > { %950 = vmatmul.mubr.msk.f32.gmra.mrb[6].mxu1 %vm427_vm2, %v406_v59 }
 0x153   : > { %661 = vmatprep.mubr.f32.mxu1 %v1211_v54 }
 0x219   : > { %v502_v36 = vpop.f32.mrb[0].mxu1 }
 0x21a   : > { %v504_v37 = vpop.f32.mrb[1].mxu1  ;;  %v503_v39 = vadd.f32 %v502_v36, %v410_v38 }
 0x21b   : > { %v505_v41 = vadd.f32 %v504_v37, %v410_v38 }
 0x21c   : > { %v525_v46 = vmax.f32 %v503_v39, 0.0 }
 0x21d   : > { %v508_v42 = vpop.f32.mrb[2].mxu1  ;;  %v526_v48 = vmax.f32 %v505_v41, 0.0 }
 0x21e   : > { %v509_v43 = vadd.f32 %v508_v42, %v415_v40  ;;  %v510_v44 = vpop.f32.mrb[3].mxu1 }
 0x21f   : > { %v511_v45 = vadd.f32 %v510_v44, %v415_v40 }
 0x220   : > { %v527_v47 = vmax.f32 %v509_v43, 0.0 }
 0x221   : > { %v528_v49 = vmax.f32 %v511_v45, 0.0  ;;  %v514_v50 = vpop.f32.mrb[4].mxu1 }
 0x222   : > { %v1067_v51 = vpack.c.bf16 %v527_v47, %v525_v46  ;;  %v516_v52 = vpop.f32.mrb[5].mxu1  ;;  %v515_v56 = vadd.f32 %v514_v50, %v420_v53 }
 0x223   : > { %v1065_v55 = vpack.c.bf16 %v528_v49, %v526_v48  ;;  %v517_v58 = vadd.f32 %v516_v52, %v420_v53 }
 0x224   : > { %v529_v7 = vmax.f32 %v515_v56, 0.0 }
 0x225   : > { %v520_v59 = vpop.f32.mrb[6].mxu1  ;;  %1066 = vmatprep.subr.bf16.mxu1 %v1065_v55  ;;  %v530_v9 = vmax.f32 %v517_v58, 0.0 }
 0x226   : > { %v521_v4 = vadd.f32 %v520_v59, %v425_v57  ;;  %v522_v5 = vpop.f32.mrb[7].mxu1  ;;  %1068 = vmatpush1.bf16.msra.mxu1 %v1067_v51 }
 0x227   : > { %v523_v6 = vadd.f32 %v522_v5, %v425_v57 }
 0x228   : > { %v531_v8 = vmax.f32 %v521_v4, 0.0 }
 0x229   : > { %v532_v10 = vmax.f32 %v523_v6, 0.0 }
 0x22a   : > { %v1071_v11 = vpack.c.bf16 %v531_v8, %v529_v7 }
 0x22b   : > { %v1069_v12 = vpack.c.bf16 %v532_v10, %v530_v9 }
 0x22d   : > { %1070 = vmatprep.subr.bf16.mxu1 %v1069_v12 }
 0x22e   : > { %1072 = vmatpush1.bf16.msra.mxu1 %v1071_v11 }
 0x231   : > { %951 = vmatmul.mubr.msk.f32.vlgmr.msra.gmra.mrb[8].mxu1 %vm427_vm2, %v1416_v60  ;;  %v1498_v60 = vld [vmem:[%s1550_s1 + $0x80] sm:$0x3] }
 0x232   : > { %667 = vmatprep.mubr.f32.mxu1 %v1211_v54 }
 0x235   : > { %952 = vmatmul.mubr.msk.f32.gmra.mrb[10].mxu1 %vm427_vm2, %v1421_v61  ;;  %v1213_v61 = vmov 64  }
 0x236   : > { %673 = vmatprep.mubr.f32.mxu1 %v1211_v54  ;;  %1136 = vset.pattern.permute.xlu1 %v1213_v61 }
 0x237   : > { %1137 = vset.pattern.permute.xlu0 %v1213_v61  ;;  %729 = vperm.xlu1 %1136, %v1498_v60  }
 0x239   : > { %953 = vmatmul.mubr.msk.f32.gmra.mrb[12].mxu1 %vm427_vm2, %v1428_v62 }
 0x23a   : > { %679 = vmatprep.mubr.f32.mxu1 %v1211_v54 }
 0x23d   : > { %954 = vmatmul.mubr.msk.f32.gmra.mrb[14].mxu1 %vm427_vm2, %v1433_v63 }
 0x23e   : > { %685 = vmatprep.mubr.f32.mxu1 %v1211_v54 }
 0x241   : > { %955 = vmatmul.mubr.msk.f32.gmra.mrb[16].mxu1 %vm427_vm2, %v1440_v0  ;;  %v544_v0 = vpop.permute.xlu1 %543 }
 0x242   : > { %691 = vmatprep.mubr.f32.mxu1 %v1211_v54 }
 0x245   : > { %956 = vmatmul.mubr.msk.f32.gmra.mrb[18].mxu1 %vm427_vm2, %v1445_v1  ;;  %v554_v23 = vpop.permute.xlu1 %553 }
 0x246   : > { %697 = vmatprep.mubr.f32.mxu1 %v1211_v54 }
 0x249   : > { %957 = vmatmul.mubr.msk.f32.gmra.mrb[20].mxu1 %vm427_vm2, %v1452_v2  ;;  %v549_v2 = vpop.permute.xlu0 %548  ;;  %v564_v39 = vpop.permute.xlu1 %563 }
 0x24a   : > { %703 = vmatprep.mubr.f32.mxu1 %v1211_v54 }
 0x24d   : > { %958 = vmatmul.mubr.msk.f32.gmra.mrb[22].mxu1 %vm427_vm2, %v1457_v3  ;;  %v559_v26 = vpop.permute.xlu0 %558  ;;  %v574_v56 = vpop.permute.xlu1 %573 }
 0x24e   : > { %799 = vmatprep.mubr.f32.mxu1 %v1211_v54 }
 0x251   : > { %v569_v42 = vpop.permute.xlu0 %568 }
 0x255   : > { %v579_v59 = vpop.permute.xlu0 %578 }
 0x304   : > { %v663_v62 = vpop.f32.mrb[8].mxu1 }
 0x305   : > { %v665_v63 = vpop.f32.mrb[9].mxu1  ;;  %v664_v1 = vadd.f32 %v663_v62, %v544_v0 }
 0x306   : > { %v666_v13 = vadd.f32 %v665_v63, %v544_v0  ;;  %v730_v63 = vpop.permute.xlu1 %729 }
 0x307   : > { %v710_v16 = vmax.f32 %v664_v1, 0.0 }
 0x308   : > { %v669_v14 = vpop.f32.mrb[10].mxu1  ;;  %v711_v18 = vmax.f32 %v666_v13, 0.0 }
 0x309   : > { %v670_v3 = vadd.f32 %v669_v14, %v549_v2  ;;  %v671_v15 = vpop.f32.mrb[11].mxu1 }
 0x30a   : > { %v672_v54 = vadd.f32 %v671_v15, %v549_v2 }
 0x30b   : > { %v712_v17 = vmax.f32 %v670_v3, 0.0 }
 0x30c   : > { %v713_v19 = vmax.f32 %v672_v54, 0.0  ;;  %v675_v20 = vpop.f32.mrb[12].mxu1 }
 0x30d   : > { %v1075_v21 = vpack.c.bf16 %v712_v17, %v710_v16  ;;  %v677_v22 = vpop.f32.mrb[13].mxu1  ;;  %v676_v25 = vadd.f32 %v675_v20, %v554_v23 }
 0x30e   : > { %v1073_v24 = vpack.c.bf16 %v713_v19, %v711_v18  ;;  %v678_v27 = vadd.f32 %v677_v22, %v554_v23 }
 0x30f   : > { %v714_v32 = vmax.f32 %v676_v25, 0.0 }
 0x310   : > { %v681_v28 = vpop.f32.mrb[14].mxu1  ;;  %1074 = vmatprep.subr.bf16.mxu1 %v1073_v24  ;;  %v715_v34 = vmax.f32 %v678_v27, 0.0 }
 0x311   : > { %v682_v29 = vadd.f32 %v681_v28, %v559_v26  ;;  %v683_v30 = vpop.f32.mrb[15].mxu1  ;;  %1076 = vmatpush1.bf16.msra.mxu1 %v1075_v21 }
 0x312   : > { %v684_v31 = vadd.f32 %v683_v30, %v559_v26 }
 0x313   : > { %v716_v33 = vmax.f32 %v682_v29, 0.0 }
 0x314   : > { %v717_v35 = vmax.f32 %v684_v31, 0.0  ;;  %v687_v36 = vpop.f32.mrb[16].mxu1 }
 0x315   : > { %v1079_v37 = vpack.c.bf16 %v716_v33, %v714_v32  ;;  %v689_v38 = vpop.f32.mrb[17].mxu1  ;;  %v688_v41 = vadd.f32 %v687_v36, %v564_v39 }
 0x316   : > { %v1077_v40 = vpack.c.bf16 %v717_v35, %v715_v34  ;;  %v690_v43 = vadd.f32 %v689_v38, %v564_v39 }
 0x317   : > { %v718_v48 = vmax.f32 %v688_v41, 0.0 }
 0x318   : > { %v693_v44 = vpop.f32.mrb[18].mxu1  ;;  %1078 = vmatprep.subr.bf16.mxu1 %v1077_v40  ;;  %v719_v50 = vmax.f32 %v690_v43, 0.0 }
 0x319   : > { %v694_v45 = vadd.f32 %v693_v44, %v569_v42  ;;  %v695_v46 = vpop.f32.mrb[19].mxu1  ;;  %1080 = vmatpush1.bf16.msra.mxu1 %v1079_v37 }
 0x31a   : > { %v696_v47 = vadd.f32 %v695_v46, %v569_v42 }
 0x31b   : > { %v720_v49 = vmax.f32 %v694_v45, 0.0 }
 0x31c   : > { %v721_v51 = vmax.f32 %v696_v47, 0.0  ;;  %v699_v52 = vpop.f32.mrb[20].mxu1 }
 0x31d   : > { %v1083_v53 = vpack.c.bf16 %v720_v49, %v718_v48  ;;  %v701_v55 = vpop.f32.mrb[21].mxu1  ;;  %v700_v58 = vadd.f32 %v699_v52, %v574_v56 }
 0x31e   : > { %v1081_v57 = vpack.c.bf16 %v721_v51, %v719_v50  ;;  %v702_v4 = vadd.f32 %v701_v55, %v574_v56 }
 0x31f   : > { %v722_v9 = vmax.f32 %v700_v58, 0.0 }
 0x320   : > { %v705_v5 = vpop.f32.mrb[22].mxu1  ;;  %1082 = vmatprep.subr.bf16.mxu1 %v1081_v57  ;;  %v723_v11 = vmax.f32 %v702_v4, 0.0 }
 0x321   : > { %v706_v6 = vadd.f32 %v705_v5, %v579_v59  ;;  %v707_v7 = vpop.f32.mrb[23].mxu1  ;;  %1084 = vmatpush1.bf16.msra.mxu1 %v1083_v53 }
 0x322   : > { %v708_v8 = vadd.f32 %v707_v7, %v579_v59 }
 0x323   : > { %v724_v10 = vmax.f32 %v706_v6, 0.0 }
 0x324   : > { %v725_v12 = vmax.f32 %v708_v8, 0.0 }
 0x325   : > { %v1087_v61 = vpack.c.bf16 %v724_v10, %v722_v9 }
 0x326   : > { %v1085_v62 = vpack.c.bf16 %v725_v12, %v723_v11 }
 0x328   : > { %1086 = vmatprep.subr.bf16.mxu1 %v1085_v62 }
 0x329   : > { %1088 = vmatpush1.bf16.msra.mxu1 %v1087_v61 }
 0x32c   : > { %959 = vmatmul.mubr.msk.f32.vlgmr.msra.gmra.mrb[24].mxu1 %vm732_vm3, %v1498_v60 }
 0x3ff   : > { %v801_v0 = vpop.f32.mrb[24].mxu1 }
 0x400   : > { %v802_v1 = vadd.f32 %v801_v0, %v730_v63  ;;  %v803_v2 = vpop.f32.mrb[25].mxu1 }
 0x401   : > { %v804_v13 = vadd.f32 %v803_v2, %v730_v63 }
 0x402   : > { %v960_v14 = vmul.f32 -1.442695, %v802_v1 }
 0x403   : > { %v961_v3 = vmul.f32 -1.442695, %v804_v13 }
 0x404   : > { %1138 = vpow2.f32 %v960_v14 }
 0x405   : > { %1140 = vpow2.f32 %v961_v3 }
 0x40e   : > { %v1139_v15 = vpop.eup %1138 }
 0x40f   : > { %v1141_v54 = vpop.eup %1140  ;;  %v812_v16 = vadd.f32 1.0, %v1139_v15 }
 0x410   : > { %v813_v17 = vadd.f32 1.0, %v1141_v54 }
 0x411   : > { %1142 = vrcp.f32 %v812_v16 }
 0x412   : > { %1144 = vrcp.f32 %v813_v17 }
 0x41b   : > { %v1143_v60 = vpop.eup %1142 }
 0x41c   : > { %v1145_v18 = vpop.eup %1144 }
 0x41d   : > { %v820_v19 = vcombine.low %v1143_v60, %v1145_v18 }
 0x41f   : > { %962 = vst.sshfl [vmem:[%s137_s25] sm:$0x33 pattern:$0x76325410] %v820_v19 }
 0x420   : > { %1159 = shalt.err (!%p1156_p3)
}
 0x421   : > { %s1160_s6 = scalar_lea.hbm %s1507_s29, 64  ;;  %s1164_s14 = scalar_lea.hbm %s1551_s2, 128 }
 0x422   : > { %p1161_p4 = scmp.ne.s32.totalorder %s1507_s29, %s1160_s6  ;;  %p1165_p9 = scmp.lt.u32.totalorder %s1507_s29, %s1551_s2 }
 0x423   : > { %p1166_p10 = scmp.lt.u32.totalorder %s1164_s14, %s1160_s6  ;;  %p1168_p12 = scmp.lt.u32.totalorder %s1160_s6, %s1507_s29 }
 0x424   : > { %p1162_p7 = pnand %p1161_p4, %p1268_p5 }
 0x425   : > { %p1167_p11 = por %p1166_p10, %p1165_p9 }
 0x426   : > { %p1163_p8 = pneg %p1162_p7 }
 0x427   : > { %p1169_p13 = por %p1168_p12, %p1167_p11 }
 0x429   : > { %p1170_p0 = pnand %p1169_p13, %p1163_p8 }
 0x42b   : > { %1173 = shalt.err (!%p1170_p0)
}
 0x42c   : > { %1089 = dma.vmem_to_hbm [thread:$0]  (%p1268_p5), %s1509_s26, 64, %s1507_s29, %s831_s30  }
 0x42d PF: > { %p1095_p1 = scmp.ge.s32.totalorder %s1208_s12, 2  ;;  %s857_s21 = sand.u32 1, %s1196_s9  }
 0x42e   : > { %s858_s22 = scalar_lea.sflag [#allocation3], %s857_s21 }
 0x42f   : > { %p1092_p2 = pnand %p1095_p1, %p1272_p6 }
 0x431   : > { %1191 = dma.done.wait (!%p1092_p2), %s858_s22, 64  }
 0x432   : > { %1193 = vsyncadd (!%p1092_p2), %s858_s22, 4294967232  ;;  %p12_p3 = scmp.ge.s32.totalorder %s1255_s15, 4   ;;  %s1556_s9 = smov %s1200_s10 }
 0x433   : > { %s1557_s10 = smov %s1204_s11  ;;  %s1558_s11 = smov %s1266_s18 }
 0x434   : > { %s1559_s12 = smov %s1255_s15  ;;  %14 = sbr.rel (!%p12_p3) target bundleno = 3 (0x3), region = 63 }
 0x43b   :  { %863 = vsyncpa [#allocation3], 1 }
 0x43c   :  { %865 = vsyncpa [#allocation3 + $0x1], 1 }

</bundles_post_ra>
